<compile_context>
chip_gen: v5e
topology: v5e:2x2
jax: 0.10.0
libtpu: 0.0.40
codegen_flags: <defaults>
</compile_context>

<pallas_src>
import functools

import jax
import jax.numpy as jnp
from jax.experimental import pallas as pl
from jax.experimental.pallas import tpu as pltpu


def gmf_kernel(uf_ref, item_ref, wu_ref, bu_ref, wa_ref, ba_ref, out_ref):
    """One batch tile of the GMF forward pass.

    uf_ref   : [TB, F]  user-features tile        (streamed)
    item_ref : [TB, D]  item-embedding tile       (streamed)
    wu_ref   : [F, D]   user-embedding weights    (resident)
    bu_ref   : [1, D]   user-embedding bias       (resident)
    wa_ref   : [1, D]   affine weights as a row   (resident)
    ba_ref   : [1, 1]   affine bias               (SMEM scalar)
    out_ref  : [1, TB]  lane-dense ratings row for this tile
    """
    # user_embedding = user_features @ W_user + b_user            -> [TB, D] (MXU)
    user_emb = (
        jnp.dot(uf_ref[...], wu_ref[...], preferred_element_type=jnp.float32)
        + bu_ref[...]
    )
    # Fused element product with the affine weights                -> [TB, D] (VPU)
    weighted = user_emb * item_ref[...] * wa_ref[...]
    # Affine output as a lane reduction instead of an N=1 matmul   -> [TB]    (XLU)
    logits = jnp.sum(weighted, axis=-1) + ba_ref[0, 0]
    # rating = sigmoid(logits)                                     -> [TB]    (EUP exp)
    rating = 1.0 / (1.0 + jnp.exp(-logits))
    # Lane-dense store: one unmasked (1, TB) row per grid step.
    out_ref[...] = rating[None, :].astype(out_ref.dtype)


def gmf_forward(user_features, item_indices, params, *, tb=512):
    """Pallas-backed GMF forward.

    user_features: [B, F] float32
    item_indices : [B]    int32
    params: dict with W_user [F,D], b_user [D], item_table [num_items,D],
            W_affine [D,1], b_affine [1]
    tb: batch tile size (multiple of 128).
    """
    B, F = user_features.shape
    D = params["W_user"].shape[1]
    assert tb % 128 == 0, "batch tile must be a multiple of 128 (lane width)"

    # Glue: embedding lookup (gather) done in plain JAX.
    # TODO(synk): fuse this gather into the kernel (scalar-prefetch-driven DMA
    # from the table kept in pl.ANY) to remove the extra [B, D] HBM round trip.
    item_emb = jnp.take(params["item_table"], item_indices, axis=0)  # [B, D]

    # Pad the batch up to a whole number of tiles; padded rows are sliced off.
    num_tiles = pl.cdiv(B, tb)
    b_pad = num_tiles * tb
    pad = b_pad - B
    if pad:
        user_features = jnp.pad(user_features, ((0, pad), (0, 0)))
        item_emb = jnp.pad(item_emb, ((0, pad), (0, 0)))

    bu = params["b_user"].reshape(1, D).astype(jnp.float32)
    wa_row = params["W_affine"].reshape(1, D).astype(jnp.float32)
    ba = params["b_affine"].reshape(1, 1).astype(jnp.float32)

    out = pl.pallas_call(
        gmf_kernel,
        out_shape=jax.ShapeDtypeStruct((1, b_pad), jnp.float32),
        grid=(num_tiles,),
        in_specs=[
            pl.BlockSpec((tb, F), lambda i: (i, 0)),   # user_features tile (streamed)
            pl.BlockSpec((tb, D), lambda i: (i, 0)),   # item_emb tile      (streamed)
            pl.BlockSpec((F, D), lambda i: (0, 0)),    # W_user             (resident)
            pl.BlockSpec((1, D), lambda i: (0, 0)),    # b_user             (resident)
            pl.BlockSpec((1, D), lambda i: (0, 0)),    # W_affine row       (resident)
            pl.BlockSpec(memory_space=pltpu.SMEM),     # b_affine scalar    (SMEM)
        ],
        out_specs=pl.BlockSpec((1, tb), lambda i: (0, i)),  # lane-dense output row
        compiler_params=pltpu.CompilerParams(
            dimension_semantics=("parallel",),        # shard batch over v7x's 2 TCs
            vmem_limit_bytes=32 * 1024 * 1024,        # safe on v7x (64 MiB physical)
        ),
    )(user_features, item_emb, params["W_user"], bu, wa_row, ba)

    # Layout plumbing only: (1, B_pad) -> (B, 1).
    return out[0, :B].reshape(B, 1)


def gmf_reference(user_features, item_indices, params):
    """Pure-JAX reference for correctness checking."""
    D = params["W_user"].shape[1]
    user_emb = user_features @ params["W_user"] + params["b_user"].reshape(1, D)
    item_emb = jnp.take(params["item_table"], item_indices, axis=0)
    prod = user_emb * item_emb
    logits = prod @ params["W_affine"] + params["b_affine"].reshape(1, 1)
    return jax.nn.sigmoid(logits)


if __name__ == "__main__":
    # Small config consistent with the module's forward. B chosen so the grid
    # has >1 tile and exercises the padding path (tb=128 -> 3 tiles).
    B = 300          # batch
    F = 16           # num_features
    D = 32           # latent_dim
    num_items = 50

    key = jax.random.PRNGKey(0)
    k1, k2, k3, k4, k5, k6, k7 = jax.random.split(key, 7)

    params = {
        # Feature2Embedding assumed to be Linear(num_features -> latent_dim).
        "W_user": jax.random.normal(k1, (F, D), jnp.float32) * 0.1,
        "b_user": jax.random.normal(k2, (D,), jnp.float32) * 0.1,
        "item_table": jax.random.normal(k3, (num_items, D), jnp.float32) * 0.1,
        "W_affine": jax.random.normal(k4, (D, 1), jnp.float32) * 0.1,
        "b_affine": jax.random.normal(k5, (1,), jnp.float32) * 0.1,
    }

    user_features = jax.random.normal(k6, (B, F), jnp.float32)
    item_indices = jax.random.randint(k7, (B,), 0, num_items, jnp.int32)

    fwd = jax.jit(functools.partial(gmf_forward, tb=128))
    rating = fwd(user_features, item_indices, params)
    rating = jax.block_until_ready(rating)

    ref = gmf_reference(user_features, item_indices, params)
    assert rating.shape == (B, 1)
    assert jnp.allclose(rating, ref, atol=1e-5, rtol=1e-5), (
        f"mismatch: max abs err {jnp.max(jnp.abs(rating - ref))}"
    )

    print("KERNEL_OK")
</pallas_src>

<mosaic_0001>
module attributes {stable_mosaic.version = 11 : i64} {
  func.func @gmf_kernel(%arg0: i32, %arg1: memref<128x16xf32, #tpu.memory_space<vmem>>, %arg2: memref<128x32xf32, #tpu.memory_space<vmem>>, %arg3: memref<16x32xf32, #tpu.memory_space<vmem>>, %arg4: memref<1x32xf32, #tpu.memory_space<vmem>>, %arg5: memref<1x32xf32, #tpu.memory_space<vmem>>, %arg6: memref<1x1xf32, #tpu.memory_space<smem>>, %arg7: memref<1x128xf32, #tpu.memory_space<vmem>>) attributes {dimension_semantics = [#tpu.dimension_semantics<parallel>], iteration_bounds = array<i64: 3>, scalar_prefetch = 0 : i64, scratch_operands = 0 : i64, tpu.core_type = #tpu.core_type<tc>, window_params = [{transform_indices = @transform_0, window_bounds = array<i64: 128, 16>}, {transform_indices = @transform_1, window_bounds = array<i64: 128, 32>}, {pipeline_mode = #tpu.pipeline_mode<synchronous>, transform_indices = @transform_2, window_bounds = array<i64: 16, 32>}, {pipeline_mode = #tpu.pipeline_mode<synchronous>, transform_indices = @transform_3, window_bounds = array<i64: 1, 32>}, {pipeline_mode = #tpu.pipeline_mode<synchronous>, transform_indices = @transform_4, window_bounds = array<i64: 1, 32>}, {transform_indices = @transform_5, window_bounds = array<i64: 1, 1>}, {transform_indices = @transform_6, window_bounds = array<i64: 1, 128>}]} {
    %c0 = arith.constant 0 : index
    %c0_0 = arith.constant 0 : index
    %0 = vector.load %arg1[%c0, %c0_0] : memref<128x16xf32, #tpu.memory_space<vmem>>, vector<128x16xf32>
    %c0_1 = arith.constant 0 : index
    %c0_2 = arith.constant 0 : index
    %1 = vector.load %arg3[%c0_1, %c0_2] : memref<16x32xf32, #tpu.memory_space<vmem>>, vector<16x32xf32>
    %cst = arith.constant dense<0.000000e+00> : vector<128x32xf32>
    %2 = tpu.matmul %0, %1, %cst {dimension_numbers = #tpu.dot_dimension_numbers<[1], [0], [0], [1], [0, 0, 1, 1], [], []>} : vector<128x16xf32>, vector<16x32xf32>, vector<128x32xf32> -> vector<128x32xf32>
    %c0_3 = arith.constant 0 : index
    %c0_4 = arith.constant 0 : index
    %3 = vector.load %arg4[%c0_3, %c0_4] : memref<1x32xf32, #tpu.memory_space<vmem>>, vector<1x32xf32>
    %4 = vector.broadcast %3 : vector<1x32xf32> to vector<128x32xf32>
    %5 = arith.addf %2, %4 : vector<128x32xf32>
    %c0_5 = arith.constant 0 : index
    %c0_6 = arith.constant 0 : index
    %6 = vector.load %arg2[%c0_5, %c0_6] : memref<128x32xf32, #tpu.memory_space<vmem>>, vector<128x32xf32>
    %7 = arith.mulf %5, %6 : vector<128x32xf32>
    %c0_7 = arith.constant 0 : index
    %c0_8 = arith.constant 0 : index
    %8 = vector.load %arg5[%c0_7, %c0_8] : memref<1x32xf32, #tpu.memory_space<vmem>>, vector<1x32xf32>
    %9 = vector.broadcast %8 : vector<1x32xf32> to vector<128x32xf32>
    %10 = arith.mulf %7, %9 : vector<128x32xf32>
    %cst_9 = arith.constant dense<0.000000e+00> : vector<128xf32>
    %11 = vector.multi_reduction <add>, %10, %cst_9 [1] : vector<128x32xf32> to vector<128xf32>
    %c0_10 = arith.constant 0 : index
    %c0_11 = arith.constant 0 : index
    %12 = memref.load %arg6[%c0_10, %c0_11] : memref<1x1xf32, #tpu.memory_space<smem>>
    %13 = vector.broadcast %12 : f32 to vector<128xf32>
    %14 = arith.addf %11, %13 : vector<128xf32>
    %cst_12 = arith.constant 0.000000e+00 : f32
    %15 = vector.broadcast %cst_12 : f32 to vector<128xf32>
    %16 = arith.subf %15, %14 : vector<128xf32>
    %17 = math.exp %16 : vector<128xf32>
    %cst_13 = arith.constant 1.000000e+00 : f32
    %18 = vector.broadcast %cst_13 : f32 to vector<128xf32>
    %19 = arith.addf %18, %17 : vector<128xf32>
    %cst_14 = arith.constant 1.000000e+00 : f32
    %20 = vector.broadcast %cst_14 : f32 to vector<128xf32>
    %21 = arith.divf %20, %19 : vector<128xf32>
    %22 = vector.shape_cast %21 : vector<128xf32> to vector<1x128xf32>
    %c0_15 = arith.constant 0 : index
    %c0_16 = arith.constant 0 : index
    %23 = vector.load %arg7[%c0_15, %c0_16] : memref<1x128xf32, #tpu.memory_space<vmem>>, vector<1x128xf32>
    tpu.vector_store %arg7[%c0_15, %c0_16], %22 {strides = array<i32>} : memref<1x128xf32, #tpu.memory_space<vmem>>, vector<1x128xf32>,
    return
  }
  func.func @transform_0(%arg0: i32) -> (i32, i32) {
    %c0_i32 = arith.constant 0 : i32
    %c0_i32_0 = arith.constant 0 : i32
    return %arg0, %c0_i32 : i32, i32
  }
  func.func @transform_1(%arg0: i32) -> (i32, i32) {
    %c0_i32 = arith.constant 0 : i32
    %c0_i32_0 = arith.constant 0 : i32
    return %arg0, %c0_i32 : i32, i32
  }
  func.func @transform_2(%arg0: i32) -> (i32, i32) {
    %c0_i32 = arith.constant 0 : i32
    %c0_i32_0 = arith.constant 0 : i32
    %c0_i32_1 = arith.constant 0 : i32
    return %c0_i32, %c0_i32_0 : i32, i32
  }
  func.func @transform_3(%arg0: i32) -> (i32, i32) {
    %c0_i32 = arith.constant 0 : i32
    %c0_i32_0 = arith.constant 0 : i32
    %c0_i32_1 = arith.constant 0 : i32
    return %c0_i32, %c0_i32_0 : i32, i32
  }
  func.func @transform_4(%arg0: i32) -> (i32, i32) {
    %c0_i32 = arith.constant 0 : i32
    %c0_i32_0 = arith.constant 0 : i32
    %c0_i32_1 = arith.constant 0 : i32
    return %c0_i32, %c0_i32_0 : i32, i32
  }
  func.func @transform_5(%arg0: i32) -> (i32, i32) {
    %c0_i32 = arith.constant 0 : i32
    %c0_i32_0 = arith.constant 0 : i32
    %c0_i32_1 = arith.constant 0 : i32
    return %c0_i32, %c0_i32_0 : i32, i32
  }
  func.func @transform_6(%arg0: i32) -> (i32, i32) {
    %c0_i32 = arith.constant 0 : i32
    %c0_i32_0 = arith.constant 0 : i32
    return %c0_i32, %arg0 : i32, i32
  }
}

</mosaic_0001>

<bundles_post_ra>
// kernel: gmf_forward.1
= control target key start
LH: loop header
LB: loop body
LE: loop exit
PB: predicated region body
PF: predicated region fallthrough
CT: control target
= control target key end

     0   :  { %s1125_s23 = smov 0   ;;  %s1767_s0 = inlined_call_operand.vmem [shape: f32[384,16], index: 0, kind: input, shape index: {}]   ;;  %s1768_s1 = inlined_call_operand.vmem [shape: f32[384,32], index: 1, kind: input, shape index: {}]   ;;  %s1769_s2 = inlined_call_operand.vmem [shape: f32[16,32], index: 2, kind: input, shape index: {}]   ;;  %s1770_s3 = inlined_call_operand.vmem [shape: f32[1,32], index: 3, kind: input, shape index: {}]   ;;  %s1771_s4 = inlined_call_operand.vmem [shape: f32[1,32], index: 4, kind: input, shape index: {}]   ;;  %s1772_s5 = inlined_call_operand.<no memory space> [shape: f32[1,1], index: 5, kind: input, shape index: {}]   ;;  %s1773_s6 = inlined_call_operand.vmem [shape: f32[1,384], index: 6, kind: output, shape index: {}]  }
   0x1   :  { %11 = sst [smem:[#allocation2]] %s1772_s5 }
   0x2 LB: > { %s1131_s24 = sadd.s32 4294967295, %s1085_s23   ;;  %p976_p0 = scmp.ge.s32.totalorder %s1085_s23, 1  ;;  %s1085_s23 = sphi %s1125_s23, %s17_s23  }
   0x3   : > { %p225_p1 = scmp.lt.s32.totalorder %s1085_s23, 4 }
   0x5   : > { %p226_p2 = pnand %p976_p0, %p225_p1 }
   0x6   : > { %s977_s28 = sshll.u32 (!%p226_p2), %s1131_s24, 4  ;;  %s510_s16 = sld [smem:[#allocation2]] (!%p226_p2) }
   0x7   : > { %229 = sbr.rel (%p226_p2) target bundleno = 369 (0x171), region = 44  ;;  %p259_p3 = scmp.lt.s32.totalorder (!%p226_p2), %s977_s28, 47 }
   0x8   : > { %p270_p4 = scmp.lt.s32.totalorder (!%p226_p2), %s1131_s24, 2 }
   0xc   : > { %v290_v0 = vld [vmem:[%s1769_s2 + $0x8] sm:$0xff]  ;;  %v289_v1 = vld [vmem:[%s1769_s2] sm:$0xff]  ;;  %s1823_s28 = smov (!%p259_p3, %s977_s28), 47  ;;  %vm295_vm0 = vcmask 130048   ;;  %vm461_vm1 = vcmask 261120   ;;  %s1825_s24 = smov (!%p270_p4, %s1131_s24), 2 }
   0xd   : > { %358 = vmatpush.msra.mxu0 %v290_v0  ;;  %999 = vmatpush.msra.mxu1 %v290_v0  ;;  %s978_s29 = sshll.u32 %s1823_s28, 3  ;;  %v1176_v18 = vld [vmem:[%s1770_s3] ss:$0 sm:$0xff]  ;;  %s272_s19 = scalar_lea.vmem %s1773_s6, %s1825_s24 }
   0xe   : > { %1000 = vmatpush.msra.mxu2 %v290_v0  ;;  %1001 = vmatpush.msra.mxu3 %v290_v0  ;;  %s262_s8 = scalar_lea.vmem %s1767_s0, %s978_s29  ;;  %s1171_s11 = scalar_lea.vmem %s1768_s1, %s978_s29  ;;  %v1185_v25 = vld [vmem:[%s1771_s4] ss:$0 sm:$0xff] }
   0xf   : > { %359 = vmatpush.msra.mxu0 %v289_v1  ;;  %1002 = vmatpush.msra.mxu1 %v289_v1  ;;  %v273_v2 = vld [vmem:[%s262_s8] sm:$0xff]  ;;  %v274_v6 = vld [vmem:[%s262_s8 + $0x8] sm:$0xff]  ;;  %v275_v10 = vld [vmem:[%s262_s8 + $0x10] sm:$0xff] }
  0x10   : > { %1003 = vmatpush.msra.mxu2 %v289_v1  ;;  %1004 = vmatpush.msra.mxu3 %v289_v1  ;;  %v277_v3 = vld [vmem:[%s262_s8 + $0x20] sm:$0xff]  ;;  %v278_v7 = vld [vmem:[%s262_s8 + $0x28] sm:$0xff]  ;;  %v279_v11 = vld [vmem:[%s262_s8 + $0x30] sm:$0xff] }
  0x11   : > { %v281_v4 = vld [vmem:[%s262_s8 + $0x40] sm:$0xff]  ;;  %981 = vmatmul.msk.f32.vlgmr.msra.gmra.mxu0 %vm295_vm0, %v273_v2  ;;  %985 = vmatmul.msk.f32.vlgmr.msra.gmra.mxu1 %vm295_vm0, %v277_v3  ;;  %v282_v8 = vld [vmem:[%s262_s8 + $0x48] sm:$0xff]  ;;  %v283_v12 = vld [vmem:[%s262_s8 + $0x50] sm:$0xff] }
  0x12   : > { %v285_v5 = vld [vmem:[%s262_s8 + $0x60] sm:$0xff]  ;;  %989 = vmatmul.msk.f32.vlgmr.msra.gmra.mxu2 %vm295_vm0, %v281_v4  ;;  %v286_v9 = vld [vmem:[%s262_s8 + $0x68] sm:$0xff]  ;;  %v287_v13 = vld [vmem:[%s262_s8 + $0x70] sm:$0xff] }
  0x13   : > { %993 = vmatmul.msk.f32.vlgmr.msra.gmra.mxu3 %vm295_vm0, %v285_v5  ;;  %v276_v14 = vld [vmem:[%s262_s8 + $0x18] sm:$0xff]  ;;  %v409_v20 = vld [vmem:[%s1171_s11] sm:$0xff]  ;;  %v410_v37 = vld [vmem:[%s1171_s11 + $0x8] sm:$0xff] }
  0x14   : > { %v280_v15 = vld [vmem:[%s262_s8 + $0x38] sm:$0xff]  ;;  %v413_v22 = vld [vmem:[%s1171_s11 + $0x20] sm:$0xff]  ;;  %v414_v42 = vld [vmem:[%s1171_s11 + $0x28] sm:$0xff] }
  0x15   : > { %v284_v16 = vld [vmem:[%s262_s8 + $0x58] sm:$0xff]  ;;  %v417_v31 = vld [vmem:[%s1171_s11 + $0x40] sm:$0xff]  ;;  %v418_v49 = vld [vmem:[%s1171_s11 + $0x48] sm:$0xff] }
  0x16   : > { %v288_v17 = vld [vmem:[%s262_s8 + $0x78] sm:$0xff]  ;;  %v411_v54 = vld [vmem:[%s1171_s11 + $0x10] sm:$0xff] }
  0x17   : > { %v415_v61 = vld [vmem:[%s1171_s11 + $0x30] sm:$0xff] }
  0x18   : > { %v419_v4 = vld [vmem:[%s1171_s11 + $0x50] sm:$0xff] }
  0x19   : > { %982 = vmatmul.msk.f32.gmra.mxu0 %vm295_vm0, %v274_v6  ;;  %986 = vmatmul.msk.f32.gmra.mxu1 %vm295_vm0, %v278_v7 }
  0x1a   : > { %990 = vmatmul.msk.f32.gmra.mxu2 %vm295_vm0, %v282_v8 }
  0x1b   : > { %994 = vmatmul.msk.f32.gmra.mxu3 %vm295_vm0, %v286_v9 }
  0x21   : > { %983 = vmatmul.msk.f32.gmra.mxu0 %vm295_vm0, %v275_v10  ;;  %987 = vmatmul.msk.f32.gmra.mxu1 %vm295_vm0, %v279_v11  ;;  %v412_v11 = vld [vmem:[%s1171_s11 + $0x18] sm:$0xff] }
  0x22   : > { %991 = vmatmul.msk.f32.gmra.mxu2 %vm295_vm0, %v283_v12 }
  0x23   : > { %995 = vmatmul.msk.f32.gmra.mxu3 %vm295_vm0, %v287_v13 }
  0x29   : > { %984 = vmatmul.msk.f32.gmra.mxu0 %vm295_vm0, %v276_v14  ;;  %988 = vmatmul.msk.f32.gmra.mxu1 %vm295_vm0, %v280_v15  ;;  %v421_v15 = vld [vmem:[%s1171_s11 + $0x60] sm:$0xff] }
  0x2a   : > { %992 = vmatmul.msk.f32.gmra.mxu2 %vm295_vm0, %v284_v16 }
  0x2b   : > { %996 = vmatmul.msk.f32.gmra.mxu3 %vm295_vm0, %v288_v17 }
  0x8e   : > { %v361_v19 = vpop.f32.mrf.mxu0  ;;  %v373_v21 = vpop.f32.mrf.mxu1 }
  0x8f   : > { %v362_v23 = vadd.f32 %v1176_v18, %v361_v19  ;;  %v374_v24 = vadd.f32 %v1176_v18, %v373_v21 }
  0x91   : > { %v425_v26 = vmul.f32 %v409_v20, %v362_v23  ;;  %v429_v27 = vmul.f32 %v413_v22, %v374_v24  ;;  %v420_v22 = vld [vmem:[%s1171_s11 + $0x58] sm:$0xff] }
  0x93   : > { %v449_v28 = vmul.f32 %v1185_v25, %v429_v27  ;;  %v445_v29 = vmul.f32 %v1185_v25, %v425_v26 }
  0x95   : > { %v385_v30 = vpop.f32.mrf.mxu2  ;;  %v474_v32 = vsel %vm461_vm1, %v449_v28, 0.0  ;;  %v462_v33 = vsel %vm461_vm1, %v445_v29, 0.0  ;;  %v423_v28 = vld [vmem:[%s1171_s11 + $0x70] sm:$0xff] }
  0x96   : > { %v397_v34 = vpop.f32.mrf.mxu3  ;;  %v386_v35 = vadd.f32 %v1176_v18, %v385_v30  ;;  %475 = vadd.xlane.f32.xlu2 %v474_v32  ;;  %v364_v36 = vpop.f32.mrf.mxu0  ;;  %463 = vadd.xlane.f32.xlu0 %v462_v33  ;;  %v416_v32 = vld [vmem:[%s1171_s11 + $0x38] sm:$0xff] }
  0x97   : > { %v376_v38 = vpop.f32.mrf.mxu1  ;;  %v365_v39 = vadd.f32 %v1176_v18, %v364_v36  ;;  %v398_v13 = vadd.f32 %v1176_v18, %v397_v34  ;;  %v424_v34 = vld [vmem:[%s1171_s11 + $0x78] sm:$0xff] }
  0x98   : > { %v377_v40 = vadd.f32 %v1176_v18, %v376_v38  ;;  %v433_v41 = vmul.f32 %v417_v31, %v386_v35 }
  0x99   : > { %v426_v43 = vmul.f32 %v410_v37, %v365_v39  ;;  %v437_v24 = vmul.f32 %v421_v15, %v398_v13 }
  0x9a   : > { %v453_v44 = vmul.f32 %v1185_v25, %v433_v41  ;;  %v430_v45 = vmul.f32 %v414_v42, %v377_v40 }
  0x9b   : > { %v446_v46 = vmul.f32 %v1185_v25, %v426_v43  ;;  %v457_v37 = vmul.f32 %v1185_v25, %v437_v24 }
  0x9c   : > { %v486_v47 = vsel %vm461_vm1, %v453_v44, 0.0  ;;  %v450_v57 = vmul.f32 %v1185_v25, %v430_v45 }
  0x9d   : > { %v388_v48 = vpop.f32.mrf.mxu2  ;;  %v465_v50 = vsel %vm461_vm1, %v446_v46, 0.0  ;;  %v498_v42 = vsel %vm461_vm1, %v457_v37, 0.0 }
  0x9e   : > { %v1202_v51 = vpop.f32.mrf.mxu3  ;;  %v389_v52 = vadd.f32 %v1176_v18, %v388_v48  ;;  %487 = vadd.xlane.f32.xlu2 %v486_v47  ;;  %v367_v53 = vpop.f32.mrf.mxu0  ;;  %466 = vadd.xlane.f32.xlu0 %v465_v50  ;;  %v477_v63 = vsel %vm461_vm1, %v450_v57, 0.0  ;;  %v422_v47 = vld [vmem:[%s1171_s11 + $0x68] sm:$0xff] }
  0x9f   : > { %v379_v55 = vpop.f32.mrf.mxu1  ;;  %v368_v56 = vadd.f32 %v1176_v18, %v367_v53  ;;  %v401_v46 = vadd.f32 %v1176_v18, %v1202_v51 }
  0xa0   : > { %v434_v58 = vmul.f32 %v418_v49, %v389_v52  ;;  %v380_v59 = vadd.f32 %v1176_v18, %v379_v55  ;;  %v1250_v55 = vstv %s510_s16 }
  0xa1   : > { %v427_v60 = vmul.f32 %v411_v54, %v368_v56  ;;  %v438_v52 = vmul.f32 %v422_v47, %v401_v46 }
  0xa2   : > { %v454_v62 = vmul.f32 %v1185_v25, %v434_v58  ;;  %v431_v1 = vmul.f32 %v415_v61, %v380_v59 }
  0xa3   : > { %v447_v0 = vmul.f32 %v1185_v25, %v427_v60  ;;  %v458_v53 = vmul.f32 %v1185_v25, %v438_v52 }
  0xa4   : > { %v489_v2 = vsel %vm461_vm1, %v454_v62, 0.0  ;;  %v451_v12 = vmul.f32 %v1185_v25, %v431_v1 }
  0xa5   : > { %v391_v3 = vpop.f32.mrf.mxu2  ;;  %v468_v5 = vsel %vm461_vm1, %v447_v0, 0.0  ;;  %v501_v54 = vsel %vm461_vm1, %v458_v53, 0.0 }
  0xa6   : > { %v403_v6 = vpop.f32.mrf.mxu3  ;;  %v392_v7 = vadd.f32 %v1176_v18, %v391_v3  ;;  %478 = vadd.xlane.f32.xlu2 %v477_v63  ;;  %469 = vadd.xlane.f32.xlu1 %v468_v5  ;;  %v370_v8 = vpop.f32.mrf.mxu0  ;;  %v480_v19 = vsel %vm461_vm1, %v451_v12, 0.0 }
  0xa7   : > { %490 = vadd.xlane.f32.xlu0 %v489_v2  ;;  %v371_v9 = vadd.f32 %v1176_v18, %v370_v8  ;;  %v382_v20 = vpop.f32.mrf.mxu1  ;;  %v404_v27 = vadd.f32 %v1176_v18, %v403_v6 }
  0xa8   : > { %v435_v10 = vmul.f32 %v419_v4, %v392_v7  ;;  %v383_v29 = vadd.f32 %v1176_v18, %v382_v20 }
  0xa9   : > { %v428_v16 = vmul.f32 %v412_v11, %v371_v9  ;;  %v439_v35 = vmul.f32 %v423_v28, %v404_v27 }
  0xaa   : > { %v455_v14 = vmul.f32 %v1185_v25, %v435_v10  ;;  %v432_v38 = vmul.f32 %v416_v32, %v383_v29  ;;  %v848_v32 = vlaneseq }
  0xab   : > { %v448_v30 = vmul.f32 %v1185_v25, %v428_v16  ;;  %v459_v43 = vmul.f32 %v1185_v25, %v439_v35 }
  0xac   : > { %v492_v17 = vsel %vm461_vm1, %v455_v14, 0.0  ;;  %v452_v44 = vmul.f32 %v1185_v25, %v432_v38 }
  0xad   : > { %v394_v21 = vpop.f32.mrf.mxu2  ;;  %v471_v39 = vsel %vm461_vm1, %v448_v30, 0.0  ;;  %v504_v48 = vsel %vm461_vm1, %v459_v43, 0.0 }
  0xae   : > { %v406_v23 = vpop.f32.mrf.mxu3  ;;  %v395_v26 = vadd.f32 %v1176_v18, %v394_v21  ;;  %493 = vadd.xlane.f32.xlu1 %v492_v17  ;;  %v483_v49 = vsel %vm461_vm1, %v452_v44, 0.0 }
  0xaf   : > { %481 = vadd.xlane.f32.xlu0 %v480_v19  ;;  %v407_v33 = vadd.f32 %v1176_v18, %v406_v23 }
  0xb0   : > { %v436_v31 = vmul.f32 %v420_v22, %v395_v26 }
  0xb1   : > { %v440_v41 = vmul.f32 %v424_v34, %v407_v33 }
  0xb2   : > { %v456_v36 = vmul.f32 %v1185_v25, %v436_v31 }
  0xb3   : > { %v460_v45 = vmul.f32 %v1185_v25, %v440_v41 }
  0xb4   : > { %v495_v40 = vsel %vm461_vm1, %v456_v36, 0.0  ;;  %v1280_v36 = vand.u32 127, %v848_v32 }
  0xb5   : > { %496 = vadd.xlane.f32.xlu2 %v495_v40  ;;  %v507_v50 = vsel %vm461_vm1, %v460_v45, 0.0 }
  0xb6   : > { %472 = vadd.xlane.f32.xlu1 %v471_v39  ;;  %v1288_v45 = vadd.s32 4294967264, %v1280_v36  ;;  %v1297_v52 = vadd.s32 4294967232, %v1280_v36 }
  0xb7   : > { %499 = vadd.xlane.f32.xlu0 %v498_v42 }
  0xbd   : > { %505 = vadd.xlane.f32.xlu2 %v504_v48 }
  0xbe   : > { %484 = vadd.xlane.f32.xlu1 %v483_v49 }
  0xbf   : > { %508 = vadd.xlane.f32.xlu0 %v507_v50 }
  0xc6   : > { %502 = vadd.xlane.f32.xlu1 %v501_v54 }
 0x109   : > { %v476_v18 = vpop.xlane.xlu2 %475  ;;  %v464_v51 = vpop.xlane.xlu0 %463 }
 0x10a   : > { %v516_v56 = vadd.f32 %v1250_v55, %v476_v18  ;;  %v512_v57 = vadd.f32 %v1250_v55, %v464_v51 }
 0x10c   : > { %v532_v58 = vsub.f32 0.0, %v516_v56  ;;  %v528_v59 = vsub.f32 0.0, %v512_v57  ;;  %v1308_v57 = vadd.s32 4294967288, %v1280_v36 }
 0x10e   : > { %v552_v60 = vmul.f32 1.442695, %v532_v58  ;;  %v544_v61 = vmul.f32 1.442695, %v528_v59 }
 0x110   : > { %1015 = vpow2.f32 %v552_v60 }
 0x111   : > { %v488_v62 = vpop.xlane.xlu2 %487  ;;  %v467_v63 = vpop.xlane.xlu0 %466  ;;  %1017 = vpow2.f32 %v544_v61 }
 0x112   : > { %v520_v25 = vadd.f32 %v1250_v55, %v488_v62  ;;  %v513_v0 = vadd.f32 %v1250_v55, %v467_v63 }
 0x114   : > { %v536_v1 = vsub.f32 0.0, %v520_v25  ;;  %v529_v2 = vsub.f32 0.0, %v513_v0  ;;  %v1328_v0 = vadd.s32 4294967256, %v1280_v36 }
 0x116   : > { %v1016_v3 = vpop.eup %1015  ;;  %v560_v4 = vmul.f32 1.442695, %v536_v1  ;;  %v546_v5 = vmul.f32 1.442695, %v529_v2 }
 0x117   : > { %v1256_v7 = vadd.f32 1.0, %v1016_v3  ;;  %v1018_v9 = vpop.eup %1017 }
 0x118   : > { %1019 = vpow2.f32 %v560_v4  ;;  %v1261_v13 = vadd.f32 1.0, %v1018_v9 }
 0x119   : > { %v479_v6 = vpop.xlane.xlu2 %478  ;;  %v470_v8 = vpop.xlane.xlu1 %469  ;;  %1021 = vpow2.f32 %v546_v5  ;;  %vm657_vm2 = vweird.f32 %v1256_v7  ;;  %v661_v49 = vand.u32 2147483647, %v1256_v7  ;;  %v663_v50 = vand.u32 2147483648, %v1256_v7 }
 0x11a   : > { %v517_v10 = vadd.f32 %v1250_v55, %v479_v6  ;;  %v491_v11 = vpop.xlane.xlu0 %490  ;;  %v514_v12 = vadd.f32 %v1250_v55, %v470_v8  ;;  %1023 = vrcp.f32 %v1256_v7  ;;  %v601_v53 = vand.u32 2147483647, %v1261_v13 }
 0x11b   : > { %v521_v15 = vadd.f32 %v1250_v55, %v491_v11  ;;  %1025 = vrcp.f32 %v1261_v13  ;;  %vm1321_vm5 = vcmp.eq.f32.partialorder %v661_v49, 8.507059e+37  ;;  %vm597_vm6 = vweird.f32 %v1261_v13 }
 0x11c   : > { %v533_v14 = vsub.f32 0.0, %v517_v10  ;;  %v530_v17 = vsub.f32 0.0, %v514_v12  ;;  %v603_v25 = vand.u32 2147483648, %v1261_v13  ;;  %v664_v1 = vor.u32 1.1754944e-38, %v663_v50 }
 0x11d   : > { %v537_v21 = vsub.f32 0.0, %v521_v15  ;;  %vm1330_vm7 = vcmp.eq.f32.partialorder %v601_v53, 8.507059e+37  ;;  %v1346_v15 = vadd.s32 4294967280, %v1280_v36 }
 0x11e   : > { %v1020_v16 = vpop.eup %1019  ;;  %v554_v20 = vmul.f32 1.442695, %v533_v14  ;;  %v548_v26 = vmul.f32 1.442695, %v530_v17  ;;  %v604_v11 = vor.u32 1.1754944e-38, %v603_v25 }
 0x11f   : > { %v1022_v19 = vpop.eup %1021  ;;  %v1267_v23 = vadd.f32 1.0, %v1020_v16  ;;  %v562_v29 = vmul.f32 1.442695, %v537_v21 }
 0x120   : > { %v1265_v22 = vpop.eup %1023  ;;  %v1269_v27 = vadd.f32 1.0, %v1022_v19  ;;  %1027 = vpow2.f32 %v554_v20 }
 0x121   : > { %v494_v24 = vpop.xlane.xlu1 %493  ;;  %v653_v28 = vmul.f32 %v1265_v22, %v1256_v7  ;;  %v1274_v31 = vpop.eup %1025  ;;  %1029 = vrcp.f32 %v1267_v23  ;;  %vm658_vm3 = vweird.f32 %v1265_v22  ;;  %v721_v5 = vand.u32 2147483647, %v1267_v23 }
 0x122   : > { %v522_v30 = vadd.f32 %v1250_v55, %v494_v24  ;;  %1031 = vpow2.f32 %v548_v26  ;;  %v593_v34 = vmul.f32 %v1274_v31, %v1261_v13  ;;  %v482_v38 = vpop.xlane.xlu0 %481  ;;  %vm1317_vm4 = vmor %vm657_vm2, %vm658_vm3  ;;  %vm598_vm8 = vweird.f32 %v1274_v31 }
 0x123   : > { %1033 = vrcp.f32 %v1269_v27  ;;  %v654_v33 = vsub.f32 1.0, %v653_v28  ;;  %v518_v47 = vadd.f32 %v1250_v55, %v482_v38  ;;  %v723_v12 = vand.u32 2147483648, %v1267_v23  ;;  %vm1352_vm9 = vmor %vm597_vm6, %vm598_vm8 }
 0x124   : > { %1035 = vpow2.f32 %v562_v29  ;;  %v538_v35 = vsub.f32 0.0, %v522_v30  ;;  %v594_v42 = vsub.f32 1.0, %v593_v34  ;;  %v618_v14 = vand.u32 2147483648, %v1269_v27 }
 0x125   : > { %v655_v41 = vmul.f32 %v1265_v22, %v654_v33  ;;  %v534_v60 = vsub.f32 0.0, %v518_v47  ;;  %vm717_vm10 = vweird.f32 %v1267_v23  ;;  %v616_v21 = vand.u32 2147483647, %v1269_v27 }
 0x126   : > { %v1028_v37 = vpop.eup %1027  ;;  %v564_v43 = vmul.f32 1.442695, %v538_v35  ;;  %v595_v56 = vmul.f32 %v1274_v31, %v594_v42  ;;  %v1370_v26 = vadd.s32 4294967216, %v1280_v36  ;;  %vm1374_vm11 = vcmp.eq.f32.partialorder %v721_v5, 8.507059e+37 }
 0x127   : > { %v1282_v39 = vpop.eup %1029  ;;  %v1290_v46 = vadd.f32 1.0, %v1028_v37  ;;  %v656_v51 = vadd.f32 %v1265_v22, %v655_v41  ;;  %v556_v9 = vmul.f32 1.442695, %v534_v60  ;;  %v724_v35 = vor.u32 1.1754944e-38, %v723_v12 }
 0x128   : > { %v1032_v40 = vpop.eup %1031  ;;  %v713_v54 = vmul.f32 %v1282_v39, %v1267_v23  ;;  %1037 = vpow2.f32 %v564_v43  ;;  %v497_v61 = vpop.xlane.xlu2 %496  ;;  %v596_v4 = vadd.f32 %v1274_v31, %v595_v56  ;;  %vm612_vm12 = vweird.f32 %v1269_v27 }
 0x129   : > { %v1285_v44 = vpop.eup %1033  ;;  %v1303_v18 = vadd.f32 1.0, %v1032_v40  ;;  %1039 = vrcp.f32 %v1290_v46  ;;  %v523_v6 = vadd.f32 %v1250_v55, %v497_v61  ;;  %v660_v7 = vsel %vm1317_vm4, %v1265_v22, %v656_v51  ;;  %v473_v16 = vpop.xlane.xlu1 %472 }
 0x12a   : > { %v1036_v48 = vpop.eup %1035  ;;  %v608_v58 = vmul.f32 %v1285_v44, %v1269_v27  ;;  %v714_v3 = vsub.f32 1.0, %v713_v54  ;;  %v1360_v22 = vadd.s32 4294967224, %v1280_v36  ;;  %v1364_v24 = vsel %vm1321_vm5, %v664_v1, %v660_v7  ;;  %v500_v47 = vpop.xlane.xlu0 %499 }
 0x12b   : > { %v1313_v59 = vadd.f32 1.0, %v1036_v48  ;;  %1041 = vrcp.f32 %v1303_v18  ;;  %v600_v13 = vsel %vm1352_vm9, %v1274_v31, %v596_v4  ;;  %v539_v28 = vsub.f32 0.0, %v523_v6 }
 0x12c   : > { %v609_v8 = vsub.f32 1.0, %v608_v58  ;;  %v715_v20 = vmul.f32 %v1282_v39, %v714_v3  ;;  %v515_v34 = vadd.f32 %v1250_v55, %v473_v16  ;;  %v619_v31 = vor.u32 1.1754944e-38, %v618_v14 }
 0x12d   : > { %1043 = vrcp.f32 %v1313_v59  ;;  %v1389_v40 = vsel %vm1330_vm7, %v604_v11, %v600_v13  ;;  %vm718_vm13 = vweird.f32 %v1282_v39  ;;  %vm1393_vm14 = vcmp.eq.f32.partialorder %v616_v21, 8.507059e+37 }
 0x12e   : > { %v1038_v10 = vpop.eup %1037  ;;  %v610_v32 = vmul.f32 %v1285_v44, %v609_v8  ;;  %1045 = vpow2.f32 %v556_v9  ;;  %v716_v41 = vadd.f32 %v1282_v39, %v715_v20  ;;  %v1398_v43 = vadd.s32 4294967248, %v1280_v36  ;;  %vm1412_vm0 = vmor %vm717_vm10, %vm718_vm13 }
 0x12f   : > { %v1348_v17 = vpop.eup %1039  ;;  %v1379_v33 = vadd.f32 1.0, %v1038_v10  ;;  %v864_v48 = vperm.slane %v1364_v24, %v1288_v45  ;;  %v678_v49 = vand.u32 2147483648, %v1290_v46  ;;  %v566_v53 = vmul.f32 1.442695, %v539_v28 }
 0x130   : > { %v668_v37 = vmul.f32 %v1348_v17, %v1290_v46  ;;  %v506_v54 = vpop.xlane.xlu2 %505  ;;  %v611_v51 = vadd.f32 %v1285_v44, %v610_v32  ;;  %vm613_vm15 = vweird.f32 %v1285_v44  ;;  %v531_v56 = vsub.f32 0.0, %v515_v34 }
 0x131   : > { %v1372_v29 = vpop.eup %1041  ;;  %1047 = vrcp.f32 %v1379_v33  ;;  %v850_v58 = vperm.slane %v1389_v40, %v1280_v36  ;;  %vm672_vm1 = vweird.f32 %v1290_v46  ;;  %v720_v25 = vsel %vm1412_vm0, %v1282_v39, %v716_v41  ;;  %vm1426_vm2 = vmor %vm612_vm12, %vm613_vm15  ;;  %v485_v7 = vpop.xlane.xlu1 %484 }
 0x132   : > { %v623_v50 = vmul.f32 %v1372_v29, %v1303_v18  ;;  %v669_v61 = vsub.f32 1.0, %v668_v37  ;;  %v550_v1 = vmul.f32 1.442695, %v531_v56  ;;  %v524_v2 = vadd.f32 %v1250_v55, %v500_v47 }
 0x133   : > { %v1385_v38 = vpop.eup %1043  ;;  %v526_v23 = vadd.f32 %v1250_v55, %v506_v54  ;;  %v676_v4 = vand.u32 2147483647, %v1290_v46  ;;  %v1431_v5 = vor.u32 1.1754944e-38, %v678_v49  ;;  %1049 = vpow2.f32 %v566_v53 }
 0x134   : > { %v728_v62 = vmul.f32 %v1385_v38, %v1313_v59  ;;  %v1046_v63 = vpop.eup %1045  ;;  %v624_v6 = vsub.f32 1.0, %v623_v50  ;;  %v615_v39 = vsel %vm1426_vm2, %v1285_v44, %v611_v51  ;;  %1051 = vpow2.f32 %v550_v1 }
 0x135   : > { %v540_v8 = vsub.f32 0.0, %v524_v2  ;;  %v542_v9 = vsub.f32 0.0, %v526_v23  ;;  %v1438_v27 = vsel %vm1374_vm11, %v724_v35, %v720_v25  ;;  %v670_v10 = vmul.f32 %v1348_v17, %v669_v61  ;;  %v509_v35 = vpop.xlane.xlu0 %508 }
 0x136   : > { %v729_v11 = vsub.f32 1.0, %v728_v62  ;;  %v1441_v12 = vadd.f32 1.0, %v1046_v63  ;;  %vm853_vm3 = vcmask 130112   ;;  %vm627_vm4 = vweird.f32 %v1303_v18 }
 0x137   : > { %v1443_v14 = vpop.eup %1047  ;;  %v631_v16 = vand.u32 2147483647, %v1303_v18  ;;  %v633_v44 = vand.u32 2147483648, %v1303_v18  ;;  %v519_v19 = vadd.f32 %v1250_v55, %v485_v7  ;;  %v620_v20 = vsel %vm1393_vm14, %v619_v31, %v615_v39 }
 0x138   : > { %vm1451_vm5 = vcmp.eq.f32.partialorder %v676_v4, 8.507059e+37  ;;  %v625_v13 = vmul.f32 %v1372_v29, %v624_v6  ;;  %vm732_vm6 = vweird.f32 %v1313_v59  ;;  %v568_v28 = vmul.f32 1.442695, %v540_v8 }
 0x139   : > { %v880_v30 = vperm.slane %v1438_v27, %v1297_v52  ;;  %vm673_vm7 = vweird.f32 %v1348_v17  ;;  %v736_v32 = vand.u32 2147483647, %v1313_v59  ;;  %v572_v34 = vmul.f32 1.442695, %v542_v9  ;;  %v1050_v37 = vpop.eup %1049 }
 0x13a   : > { %v671_v31 = vadd.f32 %v1348_v17, %v670_v10  ;;  %v730_v41 = vmul.f32 %v1385_v38, %v729_v11  ;;  %v743_v42 = vmul.f32 %v1443_v14, %v1379_v33  ;;  %1053 = vrcp.f32 %v1441_v12  ;;  %v1052_v47 = vpop.eup %1051  ;;  %vm1477_vm9 = vmor %vm672_vm1, %vm673_vm7  ;;  %v503_v10 = vpop.xlane.xlu1 %502 }
 0x13b   : > { %v852_v49 = vperm.slane %v620_v20, %v1308_v57  ;;  %v738_v50 = vand.u32 2147483648, %v1313_v59  ;;  %1055 = vpow2.f32 %v568_v28  ;;  %v535_v53 = vsub.f32 0.0, %v519_v19 }
 0x13c   : > { %v626_v54 = vadd.f32 %v1372_v29, %v625_v13  ;;  %vm628_vm8 = vweird.f32 %v1372_v29  ;;  %v1470_v51 = vadd.f32 1.0, %v1052_v47  ;;  %v527_v56 = vadd.f32 %v1250_v55, %v509_v35 }
 0x13d   : > { %vm733_vm10 = vweird.f32 %v1385_v38  ;;  %v1482_v57 = vadd.f32 1.0, %v1050_v37  ;;  %1057 = vpow2.f32 %v572_v34  ;;  %v558_v61 = vmul.f32 1.442695, %v535_v53  ;;  %vm1491_vm11 = vmor %vm627_vm4, %vm628_vm8 }
 0x13e   : > { %v675_v62 = vsel %vm1477_vm9, %v1348_v17, %v671_v31  ;;  %v731_v63 = vadd.f32 %v1385_v38, %v730_v41  ;;  %v744_v25 = vsub.f32 1.0, %v743_v42  ;;  %1059 = vrcp.f32 %v1470_v51  ;;  %vm1519_vm15 = vmor %vm732_vm6, %vm733_vm10 }
 0x13f   : > { %vm1495_vm12 = vcmp.eq.f32.partialorder %v631_v16, 8.507059e+37  ;;  %v634_v2 = vor.u32 1.1754944e-38, %v633_v44  ;;  %vm1499_vm13 = vcmp.eq.f32.partialorder %v736_v32, 8.507059e+37  ;;  %1061 = vpow2.f32 %v558_v61 }
 0x140   : > { %v1503_v17 = vpop.eup %1053  ;;  %v630_v18 = vsel %vm1491_vm11, %v1372_v29, %v626_v54  ;;  %v751_v3 = vand.u32 2147483647, %v1379_v33  ;;  %v753_v4 = vand.u32 2147483648, %v1379_v33  ;;  %v543_v6 = vsub.f32 0.0, %v527_v56 }
 0x141   : > { %v1056_v7 = vpop.eup %1055  ;;  %v1513_v39 = vsel %vm1451_vm5, %v1431_v5, %v675_v62  ;;  %vm857_vm14 = vcmask 195712   ;;  %v739_v29 = vor.u32 1.1754944e-38, %v738_v50  ;;  %v1524_v9 = vadd.s32 4294967208, %v1280_v36 }
 0x142   : > { %1063 = vrcp.f32 %v1482_v57  ;;  %v854_v5 = vsel %vm853_vm3, %v852_v49, %v850_v58  ;;  %v735_v59 = vsel %vm1519_vm15, %v1385_v38, %v731_v63  ;;  %v745_v11 = vmul.f32 %v1443_v14, %v744_v25 }
 0x143   : > { %vm747_vm0 = vweird.f32 %v1379_v33  ;;  %v1058_v16 = vpop.eup %1057  ;;  %v635_v44 = vsel %vm1495_vm12, %v634_v2, %v630_v18  ;;  %v683_v19 = vmul.f32 %v1503_v17, %v1441_v12  ;;  %v1541_v20 = vadd.s32 4294967272, %v1280_v36 }
 0x144   : > { %v574_v40 = vmul.f32 1.442695, %v543_v6  ;;  %v1060_v58 = vpop.eup %1059  ;;  %v868_v21 = vperm.slane %v1513_v39, %v1328_v0  ;;  %vm1545_vm1 = vcmp.eq.f32.partialorder %v751_v3, 8.507059e+37  ;;  %v754_v13 = vor.u32 1.1754944e-38, %v753_v4 }
 0x145   : > { %v1549_v28 = vadd.f32 1.0, %v1056_v7  ;;  %v525_v32 = vadd.f32 %v1250_v55, %v503_v10  ;;  %v1062_v34 = vpop.eup %1061  ;;  %v1554_v35 = vsel %vm1499_vm13, %v739_v29, %v735_v59  ;;  %vm748_vm2 = vweird.f32 %v1443_v14 }
 0x146   : > { %v691_v37 = vand.u32 2147483647, %v1441_v12  ;;  %v638_v31 = vmul.f32 %v1060_v58, %v1470_v51  ;;  %v856_v41 = vperm.slane %v635_v44, %v1346_v15  ;;  %v746_v42 = vadd.f32 %v1443_v14, %v745_v11  ;;  %vm1577_vm5 = vmor %vm747_vm0, %vm748_vm2 }
 0x147   : > { %v693_v47 = vand.u32 2147483648, %v1441_v12  ;;  %v1562_v49 = vadd.f32 1.0, %v1058_v16  ;;  %v684_v50 = vsub.f32 1.0, %v683_v19  ;;  %vm687_vm3 = vweird.f32 %v1441_v12 }
 0x148   : > { %v1564_v55 = vpop.eup %1063  ;;  %vm861_vm4 = vcmask 261312   ;;  %v639_v53 = vsub.f32 1.0, %v638_v31  ;;  %v1567_v54 = vadd.f32 1.0, %v1062_v34  ;;  %1065 = vpow2.f32 %v574_v40 }
 0x149   : > { %v884_v56 = vperm.slane %v1554_v35, %v1360_v22  ;;  %v648_v15 = vand.u32 2147483648, %v1470_v51  ;;  %1067 = vrcp.f32 %v1549_v28  ;;  %v541_v60 = vsub.f32 0.0, %v525_v32 }
 0x14a   : > { %v640_v62 = vmul.f32 %v1060_v58, %v639_v53  ;;  %vm643_vm6 = vweird.f32 %v1060_v58  ;;  %v646_v63 = vand.u32 2147483647, %v1470_v51  ;;  %1069 = vrcp.f32 %v1567_v54 }
 0x14b   : > { %v750_v25 = vsel %vm1577_vm5, %v1443_v14, %v746_v42  ;;  %v694_v46 = vor.u32 1.1754944e-38, %v693_v47  ;;  %v758_v1 = vmul.f32 %v1564_v55, %v1482_v57  ;;  %vm865_vm7 = vcmask 326912  }
 0x14c   : > { %1071 = vrcp.f32 %v1562_v49  ;;  %v685_v33 = vmul.f32 %v1503_v17, %v684_v50  ;;  %v641_v2 = vadd.f32 %v1060_v58, %v640_v62  ;;  %vm642_vm8 = vweird.f32 %v1470_v51 }
 0x14d   : > { %v1592_v23 = vadd.s32 4294967200, %v1280_v36  ;;  %v858_v18 = vsel %vm857_vm14, %v856_v41, %v854_v5  ;;  %vm644_vm9 = vmor %vm642_vm8, %vm643_vm6  ;;  %v649_v3 = vor.u32 1.1754944e-38, %v648_v15  ;;  %v1596_v14 = vadd.s32 4294967184, %v1280_v36 }
 0x14e   : > { %v570_v4 = vmul.f32 1.442695, %v541_v60  ;;  %v1066_v6 = vpop.eup %1065  ;;  %v1600_v7 = vsel %vm1545_vm1, %v754_v13, %v750_v25  ;;  %vm1602_vm10 = vcmp.eq.f32.partialorder %v691_v37, 8.507059e+37  ;;  %v768_v51 = vand.u32 2147483648, %v1482_v57 }
 0x14f   : > { %v645_v29 = vsel %vm644_vm9, %v1060_v58, %v641_v2  ;;  %vm647_vm11 = vcmp.eq.f32.partialorder %v646_v63, 8.507059e+37  ;;  %v1607_v10 = vpop.eup %1067  ;;  %v759_v5 = vsub.f32 1.0, %v758_v1  ;;  %v1609_v11 = vadd.f32 1.0, %v1066_v6 }
 0x150   : > { %v650_v59 = vsel %vm647_vm11, %v649_v3, %v645_v29  ;;  %1073 = vpow2.f32 %v570_v4  ;;  %v1070_v16 = vpop.eup %1069  ;;  %v686_v44 = vadd.f32 %v1503_v17, %v685_v33  ;;  %vm688_vm12 = vweird.f32 %v1503_v17 }
 0x151   : > { %v860_v19 = vperm.slane %v650_v59, %v1541_v20  ;;  %vm869_vm13 = vcmask 392512   ;;  %vm762_vm14 = vweird.f32 %v1482_v57  ;;  %v766_v58 = vand.u32 2147483647, %v1482_v57  ;;  %vm1626_vm0 = vmor %vm687_vm3, %vm688_vm12 }
 0x152   : > { %v1614_v40 = vpop.eup %1071  ;;  %v698_v38 = vmul.f32 %v1070_v16, %v1567_v54  ;;  %1075 = vrcp.f32 %v1609_v11  ;;  %v888_v13 = vperm.slane %v1600_v7, %v1370_v26  ;;  %v769_v32 = vor.u32 1.1754944e-38, %v768_v51 }
 0x153   : > { %v773_v34 = vmul.f32 %v1607_v10, %v1549_v28  ;;  %vm873_vm15 = vcmask 458112   ;;  %v760_v37 = vmul.f32 %v1564_v55, %v759_v5  ;;  %v862_v31 = vsel %vm861_vm4, %v860_v19, %v858_v18 }
 0x154   : > { %v875_v41 = vadd.s32 4294967240, %v1280_v36  ;;  %v699_v42 = vsub.f32 1.0, %v698_v38  ;;  %v690_v47 = vsel %vm1626_vm0, %v1503_v17, %v686_v44  ;;  %v803_v50 = vmul.f32 %v1614_v40, %v1562_v49 }
 0x155   : > { %vm877_vm1 = vcmask 523712   ;;  %v708_v12 = vand.u32 2147483648, %v1567_v54  ;;  %vm881_vm2 = vcmask 589312   ;;  %vm703_vm3 = vweird.f32 %v1070_v16 }
 0x156   : > { %v1074_v53 = vpop.eup %1073  ;;  %v700_v15 = vmul.f32 %v1070_v16, %v699_v42  ;;  %v706_v60 = vand.u32 2147483647, %v1567_v54  ;;  %vm763_vm4 = vweird.f32 %v1564_v55  ;;  %vm1641_vm5 = vcmp.eq.f32.partialorder %v766_v58, 8.507059e+37 }
 0x157   : > { %v866_v17 = vsel %vm865_vm7, %v864_v48, %v862_v31  ;;  %v774_v62 = vsub.f32 1.0, %v773_v34  ;;  %vm885_vm6 = vcmask 654912   ;;  %v1649_v63 = vadd.f32 1.0, %v1074_v53 }
 0x158   : > { %v1651_v25 = vpop.eup %1075  ;;  %v695_v1 = vsel %vm1602_vm10, %v694_v46, %v690_v47  ;;  %v761_v33 = vadd.f32 %v1564_v55, %v760_v37  ;;  %v701_v2 = vadd.f32 %v1070_v16, %v700_v15  ;;  %vm702_vm8 = vweird.f32 %v1567_v54  ;;  %vm1673_vm10 = vmor %vm762_vm14, %vm763_vm4 }
 0x159   : > { %v804_v18 = vsub.f32 1.0, %v803_v50  ;;  %vm704_vm9 = vmor %vm702_vm8, %vm703_vm3  ;;  %v709_v3 = vor.u32 1.1754944e-38, %v708_v12  ;;  %v818_v45 = vmul.f32 %v1651_v25, %v1609_v11  ;;  %1077 = vrcp.f32 %v1649_v63 }
 0x15a   : > { %v705_v24 = vsel %vm704_vm9, %v1070_v16, %v701_v2  ;;  %vm707_vm7 = vcmp.eq.f32.partialorder %v706_v60, 8.507059e+37  ;;  %v870_v48 = vsel %vm869_vm13, %v868_v21, %v866_v17  ;;  %v1665_v46 = vadd.s32 4294967176, %v1280_v36 }
 0x15b   : > { %v872_v54 = vperm.slane %v695_v1, %v1398_v43  ;;  %v775_v4 = vmul.f32 %v1607_v10, %v774_v62  ;;  %v710_v6 = vsel %vm707_vm7, %v709_v3, %v705_v24  ;;  %v819_v8 = vsub.f32 1.0, %v818_v45 }
 0x15c   : > { %v781_v0 = vand.u32 2147483647, %v1549_v28  ;;  %v783_v39 = vand.u32 2147483648, %v1549_v28  ;;  %v876_v21 = vperm.slane %v710_v6, %v875_v41  ;;  %vm889_vm11 = vcmask 720512  }
 0x15d   : > { %v765_v43 = vsel %vm1673_vm10, %v1564_v55, %v761_v33  ;;  %v805_v29 = vmul.f32 %v1614_v40, %v804_v18  ;;  %v874_v5 = vsel %vm873_vm15, %v872_v54, %v870_v48  ;;  %vm893_vm12 = vcmask 786112  }
 0x15e   : > { %vm777_vm13 = vweird.f32 %v1549_v28  ;;  %vm807_vm14 = vweird.f32 %v1562_v49  ;;  %v878_v57 = vsel %vm877_vm1, %v876_v21, %v874_v5  ;;  %v820_v59 = vmul.f32 %v1651_v25, %v819_v8 }
 0x15f   : > { %v1078_v16 = vpop.eup %1077  ;;  %v776_v44 = vadd.f32 %v1607_v10, %v775_v4  ;;  %vm778_vm0 = vweird.f32 %v1607_v10  ;;  %v811_v55 = vand.u32 2147483647, %v1562_v49  ;;  %v882_v19 = vsel %vm881_vm2, %v880_v30, %v878_v57 }
 0x160   : > { %v770_v58 = vsel %vm1641_vm5, %v769_v32, %v765_v43  ;;  %vm1697_vm15 = vcmp.eq.f32.partialorder %v781_v0, 8.507059e+37  ;;  %v784_v34 = vor.u32 1.1754944e-38, %v783_v39  ;;  %vm897_vm1 = vcmask 851712   ;;  %vm1708_vm4 = vmor %vm777_vm13, %vm778_vm0 }
 0x161   : > { %v788_v20 = vmul.f32 %v1078_v16, %v1649_v63  ;;  %v806_v37 = vadd.f32 %v1614_v40, %v805_v29  ;;  %vm808_vm3 = vweird.f32 %v1614_v40  ;;  %v813_v52 = vand.u32 2147483648, %v1562_v49 }
 0x162   : > { %vm822_vm2 = vweird.f32 %v1609_v11  ;;  %v886_v30 = vsel %vm885_vm6, %v884_v56, %v882_v19  ;;  %v821_v32 = vadd.f32 %v1651_v25, %v820_v59  ;;  %vm823_vm5 = vweird.f32 %v1651_v25  ;;  %vm1727_vm6 = vmor %vm807_vm14, %vm808_vm3 }
 0x163   : > { %v789_v31 = vsub.f32 1.0, %v788_v20  ;;  %v780_v41 = vsel %vm1708_vm4, %v1607_v10, %v776_v44  ;;  %v826_v28 = vand.u32 2147483647, %v1609_v11  ;;  %v828_v42 = vand.u32 2147483648, %v1609_v11  ;;  %vm1738_vm9 = vmor %vm822_vm2, %vm823_vm5 }
 0x164   : > { %v798_v47 = vand.u32 2147483648, %v1649_v63  ;;  %v892_v50 = vperm.slane %v770_v58, %v1524_v9  ;;  %vm793_vm8 = vweird.f32 %v1078_v16  ;;  %v796_v56 = vand.u32 2147483647, %v1649_v63 }
 0x165   : > { %v790_v35 = vmul.f32 %v1078_v16, %v789_v31  ;;  %v810_v10 = vsel %vm1727_vm6, %v1614_v40, %v806_v37  ;;  %v814_v12 = vor.u32 1.1754944e-38, %v813_v52  ;;  %v899_v49 = vadd.s32 4294967192, %v1280_v36 }
 0x166   : > { %v890_v53 = vsel %vm889_vm11, %v888_v13, %v886_v30  ;;  %v785_v15 = vsel %vm1697_vm15, %v784_v34, %v780_v41  ;;  %v825_v40 = vsel %vm1738_vm9, %v1651_v25, %v821_v32  ;;  %vm792_vm7 = vweird.f32 %v1649_v63 }
 0x167   : > { %v791_v60 = vadd.f32 %v1078_v16, %v790_v35  ;;  %vm812_vm10 = vcmp.eq.f32.partialorder %v811_v55, 8.507059e+37  ;;  %vm827_vm13 = vcmp.eq.f32.partialorder %v826_v28, 8.507059e+37  ;;  %v829_v11 = vor.u32 1.1754944e-38, %v828_v42  ;;  %vm794_vm14 = vmor %vm792_vm7, %vm793_vm8 }
 0x168   : > { %v799_v36 = vor.u32 1.1754944e-38, %v798_v47  ;;  %v815_v61 = vsel %vm812_vm10, %v814_v12, %v810_v10  ;;  %vm797_vm11 = vcmp.eq.f32.partialorder %v796_v56, 8.507059e+37  ;;  %v894_v7 = vsel %vm893_vm12, %v892_v50, %v890_v53 }
 0x169   : > { %v795_v26 = vsel %vm794_vm14, %v1078_v16, %v791_v60  ;;  %v896_v13 = vperm.slane %v785_v15, %v1592_v23  ;;  %v830_v17 = vsel %vm827_vm13, %v829_v11, %v825_v40  ;;  %vm901_vm0 = vcmask 917312  }
 0x16a   : > { %v800_v62 = vsel %vm797_vm11, %v799_v36, %v795_v26  ;;  %vm905_vm15 = vcmask 982912   ;;  %v904_v63 = vperm.slane %v815_v61, %v1596_v14  ;;  %vm909_vm3 = vcmask 1048512  }
 0x16b   : > { %v900_v25 = vperm.slane %v800_v62, %v899_v49  ;;  %v898_v1 = vsel %vm897_vm1, %v896_v13, %v894_v7  ;;  %v908_v33 = vperm.slane %v830_v17, %v1665_v46 }
 0x16d   : > { %v902_v2 = vsel %vm901_vm0, %v900_v25, %v898_v1 }
 0x16e   : > { %v906_v18 = vsel %vm905_vm15, %v904_v63, %v902_v2 }
 0x16f   : > { %v910_v3 = vsel %vm909_vm3, %v908_v33, %v906_v18 }
 0x170   : > { %912 = vst [vmem:[%s272_s19] sm:$0x1] %v910_v3 }
 0x171 PF: > { %s17_s23 = sadd.s32 1, %s1085_s23  }
 0x172   : > { %p14_p5 = scmp.ge.s32.totalorder %s17_s23, 5  }
 0x174   :  { %16 = sbr.rel (!%p14_p5) target bundleno = 2 (0x2), region = 77 }

</bundles_post_ra>
